<compile_context>
chip_gen: v6e
topology: v6e:2x2x1
jax: 0.10.0
libtpu: 0.0.40
codegen_flags: <defaults>
</compile_context>

<pallas_src>
import functools
import math

import jax
import jax.numpy as jnp
from jax.experimental import pallas as pl
from jax.experimental.pallas import tpu as pltpu

EMBED_DIM = 8            # embedding_dim
HIDDEN = 256             # hard-coded 256 in TinyEmbedFFNN.linear1
N_FEATURES = 35
N_EMB = 33               # embedding layers for features 3..35 (columns 2..34)
VOCAB = 12               # synthetic len(feature_dict[str(i)])
TARGET_TILE_ROWS = 512   # pool rows per grid step; fits v5e/v6e/v7x VMEM budgets


def _round_up(x, m):
    return ((x + m - 1) // m) * m


def _tiny_ffnn_kernel(p, groups, pool, seed_ref, x_ref, w1_ref, b1_ref,
                      w2t_ref, o_ref):
    """One tile of `groups` whole pool-groups (groups*pool rows) per grid step.

    x_ref  : (TILE_M, F_pad)  bf16  concatenated embedded features
    w1_ref : (F_pad, 256)     bf16
    b1_ref : (1, 256)         f32
    w2t_ref: (1, 256)         f32   (linear2 weight, transposed)
    o_ref  : (1, TILE_M)      f32   per-pool-group softmax, lane-dense
    """
    # linear1 on the MXU, f32 accumulation.
    h = jnp.dot(x_ref[...], w1_ref[...],
                preferred_element_type=jnp.float32)           # (TILE_M, 256)
    h = h + b1_ref[...]                                       # (1,256) bcast

    if p > 0.0:
        # F.dropout (training=True): inverted dropout via integer threshold.
        # TODO(synk): TPU hardware PRNG, not bit-identical to torch's RNG.
        pltpu.prng_seed(seed_ref[0] + pl.program_id(0))
        bits = pltpu.bitcast(pltpu.prng_random_bits(h.shape), jnp.uint32)
        thresh = jnp.uint32(min(int(round(p * float(1 << 32))), (1 << 32) - 1))
        h = jnp.where(bits >= thresh, h * (1.0 / (1.0 - p)), 0.0)

    h = jnp.maximum(h, 0.0)                                   # ReLU

    # linear2 (256 -> 1) as VPU multiply + lane reduction (MXU N=1 wastes the
    # array).  b2 is omitted: adding one scalar to every logit of a pool group
    # is a softmax no-op.
    h3 = h.reshape(groups, pool, HIDDEN)                      # leading split
    logits = jnp.sum(h3 * w2t_ref[...], axis=-1)              # (groups, pool)

    # Segmented softmax over each pool group (PyTorch nn.Softmax(dim=1)).
    m = jnp.max(logits, axis=-1, keepdims=True)
    e = jnp.exp(logits - m)
    probs = e / jnp.sum(e, axis=-1, keepdims=True)            # (groups, pool)

    # Lane-dense store: one (1, TILE_M) row per tile.
    o_ref[...] = probs.reshape(1, groups * pool)


def _embed_features(x, tables):
    """(B, P, 35) float input -> (B, P, 35*E) concatenated features."""
    B, P, _ = x.shape
    E = tables.shape[-1]
    # Numeric columns 0..1, each repeated E times (matches torch .repeat).
    num = jnp.repeat(x[:, :, :2], E, axis=-1)                 # (B, P, 2E)
    # One vectorized gather over a flattened table instead of 33 gathers.
    idx = x[:, :, 2:].astype(jnp.int32)                       # (B, P, 33)
    flat_tables = tables.reshape(-1, E)                       # (33*V, E)
    offs = jnp.arange(N_EMB, dtype=jnp.int32) * tables.shape[1]
    emb = jnp.take(flat_tables, idx + offs, axis=0)           # (B, P, 33, E)
    return jnp.concatenate([num, emb.reshape(B, P, N_EMB * E)], axis=-1)


def tiny_embed_ffnn_forward(x, params, p=0.0, seed=0,
                            compute_dtype=jnp.bfloat16,
                            target_tile_rows=TARGET_TILE_ROWS):
    """x: (B, P, 35) float32. Returns (B, P, 1) float32 (softmax over P)."""
    tables = params["emb"]                       # (33, VOCAB, E)
    w1, b1 = params["w1"], params["b1"]          # (280, 256), (1, 256)
    w2 = params["w2"]                            # (256, 1); b2 unused (no-op)
    B, P, _ = x.shape

    feat = _embed_features(x, tables)            # (B, P, 280) f32
    F_in = feat.shape[-1]
    F_pad = _round_up(F_in, 128)                 # 280 -> 384 aligned K

    # Tile geometry: whole pool groups per tile, TILE_M a multiple of 8.
    base = 8 // math.gcd(P, 8)                   # group granularity per tile
    tb = max(base, (max(1, target_tile_rows // P) // base) * base)
    tb = min(tb, _round_up(B, base))             # never bigger than the work
    groups_pad = _round_up(B, tb)
    num_tiles = groups_pad // tb
    tile_m = tb * P

    feat2 = feat.reshape(B * P, F_in)
    feat2 = jnp.pad(feat2, ((0, groups_pad * P - B * P), (0, F_pad - F_in)))
    feat2 = feat2.astype(compute_dtype)
    w1p = jnp.pad(w1, ((0, F_pad - F_in), (0, 0))).astype(compute_dtype)
    b1r = b1.reshape(1, HIDDEN).astype(jnp.float32)
    w2t = w2.reshape(1, HIDDEN).astype(jnp.float32)           # == w2.T

    seed_arr = jnp.array([seed], dtype=jnp.int32)
    kernel = functools.partial(_tiny_ffnn_kernel, float(p), tb, P)

    out = pl.pallas_call(
        kernel,
        out_shape=jax.ShapeDtypeStruct((num_tiles, 1, tile_m), jnp.float32),
        grid_spec=pltpu.PrefetchScalarGridSpec(
            num_scalar_prefetch=1,               # dropout seed lives in SMEM
            grid=(num_tiles,),
            in_specs=[
                pl.BlockSpec((tile_m, F_pad), lambda t, s: (t, 0)),
                pl.BlockSpec((F_pad, HIDDEN), lambda t, s: (0, 0)),
                pl.BlockSpec((1, HIDDEN), lambda t, s: (0, 0)),
                pl.BlockSpec((1, HIDDEN), lambda t, s: (0, 0)),
            ],
            out_specs=pl.BlockSpec((None, 1, tile_m), lambda t, s: (t, 0, 0)),
        ),
        compiler_params=pltpu.CompilerParams(
            dimension_semantics=("parallel",)),
    )(seed_arr, feat2, w1p, b1r, w2t)

    return out.reshape(groups_pad, P)[:B].reshape(B, P, 1)


def _reference(x, params, compute_dtype=jnp.bfloat16):
    """Pure-JAX reference (p=0 -> dropout is identity), bf16-matched matmul-1."""
    tables, w1, b1 = params["emb"], params["w1"], params["b1"]
    w2, b2 = params["w2"], params["b2"]
    feat = _embed_features(x, tables)
    h = jnp.dot(feat.astype(compute_dtype), w1.astype(compute_dtype),
                preferred_element_type=jnp.float32) + b1
    h = jnp.maximum(h, 0.0)
    logits = jnp.dot(h, w2, precision=jax.lax.Precision.HIGHEST) + b2
    return jax.nn.softmax(logits, axis=1)


if __name__ == "__main__":
    key = jax.random.PRNGKey(0)
    B, P = 5, 8
    ks = jax.random.split(key, 8)

    # Deterministic synthetic parameters (shapes from the module __init__).
    tables = jax.random.normal(ks[0], (N_EMB, VOCAB, EMBED_DIM), jnp.float32) * 0.1
    w1 = jax.random.normal(ks[1], (N_FEATURES * EMBED_DIM, HIDDEN), jnp.float32) * 0.05
    b1 = jax.random.normal(ks[2], (1, HIDDEN), jnp.float32) * 0.05
    w2 = jax.random.normal(ks[3], (HIDDEN, 1), jnp.float32) * 0.05
    b2 = jax.random.normal(ks[4], (1, 1), jnp.float32) * 0.05
    params = dict(emb=tables, w1=w1, b1=b1, w2=w2, b2=b2)

    # Input: 2 numeric cols + 33 integer-valued (category id) cols, as floats.
    x_num = jax.random.uniform(ks[5], (B, P, 2), jnp.float32)
    x_cat = jax.random.randint(ks[6], (B, P, N_EMB), 0, VOCAB).astype(jnp.float32)
    x = jnp.concatenate([x_num, x_cat], axis=2)               # (B, P, 35)

    ref = _reference(x, params)

    # p=0.0 for the numeric check (TPU PRNG != torch RNG stream).
    # (a) multi-tile path: 2 pool groups / tile -> 3 grid steps, 1 padded group
    out_a = jax.block_until_ready(
        tiny_embed_ffnn_forward(x, params, p=0.0, target_tile_rows=16))
    # (b) default large-tile path: all groups in a single tile
    out_b = jax.block_until_ready(tiny_embed_ffnn_forward(x, params, p=0.0))

    for out in (out_a, out_b):
        assert out.shape == (B, P, 1)
        assert bool(jnp.all(jnp.isfinite(out)))
        assert jnp.allclose(out, ref, atol=1e-3, rtol=1e-3), \
            float(jnp.max(jnp.abs(out - ref)))
        assert jnp.allclose(out.sum(axis=1), 1.0, atol=1e-4)  # softmax per pool

    print("KERNEL_OK")
</pallas_src>

<mosaic_0001>
module attributes {stable_mosaic.version = 11 : i64} {
  func.func @_tiny_ffnn_kernel(%arg0: i32, %arg1: memref<1xi32, #tpu.memory_space<smem>>, %arg2: memref<16x384xbf16, #tpu.memory_space<vmem>>, %arg3: memref<384x256xbf16, #tpu.memory_space<vmem>>, %arg4: memref<1x256xf32, #tpu.memory_space<vmem>>, %arg5: memref<1x256xf32, #tpu.memory_space<vmem>>, %arg6: memref<1x1x16xf32, #tpu.memory_space<vmem>>) attributes {dimension_semantics = [#tpu.dimension_semantics<parallel>], iteration_bounds = array<i64: 3>, scalar_prefetch = 1 : i64, scratch_operands = 0 : i64, tpu.core_type = #tpu.core_type<tc>, window_params = [{transform_indices = @transform_0, window_bounds = array<i64: 16, 384>}, {pipeline_mode = #tpu.pipeline_mode<synchronous>, transform_indices = @transform_1, window_bounds = array<i64: 384, 256>}, {pipeline_mode = #tpu.pipeline_mode<synchronous>, transform_indices = @transform_2, window_bounds = array<i64: 1, 256>}, {pipeline_mode = #tpu.pipeline_mode<synchronous>, transform_indices = @transform_3, window_bounds = array<i64: 1, 256>}, {transform_indices = @transform_4, window_bounds = array<i64: 1, 1, 16>}]} {
    %c0 = arith.constant 0 : index
    %c0_0 = arith.constant 0 : index
    %0 = vector.load %arg2[%c0, %c0_0] : memref<16x384xbf16, #tpu.memory_space<vmem>>, vector<16x384xbf16>
    %c0_1 = arith.constant 0 : index
    %c0_2 = arith.constant 0 : index
    %1 = vector.load %arg3[%c0_1, %c0_2] : memref<384x256xbf16, #tpu.memory_space<vmem>>, vector<384x256xbf16>
    %cst = arith.constant dense<0.000000e+00> : vector<16x256xf32>
    %2 = tpu.matmul %0, %1, %cst {dimension_numbers = #tpu.dot_dimension_numbers<[1], [0], [0], [1], [0, 0, 1, 1], [], []>} : vector<16x384xbf16>, vector<384x256xbf16>, vector<16x256xf32> -> vector<16x256xf32>
    %c0_3 = arith.constant 0 : index
    %c0_4 = arith.constant 0 : index
    %3 = vector.load %arg4[%c0_3, %c0_4] : memref<1x256xf32, #tpu.memory_space<vmem>>, vector<1x256xf32>
    %4 = vector.broadcast %3 : vector<1x256xf32> to vector<16x256xf32>
    %5 = arith.addf %2, %4 : vector<16x256xf32>
    %cst_5 = arith.constant 0.000000e+00 : f32
    %6 = vector.broadcast %cst_5 : f32 to vector<16x256xf32>
    %7 = arith.maximumf %5, %6 : vector<16x256xf32>
    %8 = vector.shape_cast %7 : vector<16x256xf32> to vector<2x8x256xf32>
    %c0_6 = arith.constant 0 : index
    %c0_7 = arith.constant 0 : index
    %9 = vector.load %arg5[%c0_6, %c0_7] : memref<1x256xf32, #tpu.memory_space<vmem>>, vector<1x256xf32>
    %10 = vector.shape_cast %9 : vector<1x256xf32> to vector<1x1x256xf32>
    %11 = vector.broadcast %10 : vector<1x1x256xf32> to vector<2x8x256xf32>
    %12 = arith.mulf %8, %11 : vector<2x8x256xf32>
    %cst_8 = arith.constant dense<0.000000e+00> : vector<2x8xf32>
    %13 = vector.multi_reduction <add>, %12, %cst_8 [2] : vector<2x8x256xf32> to vector<2x8xf32>
    %cst_9 = arith.constant dense<0xFF800000> : vector<2xf32>
    %14 = vector.multi_reduction <maximumf>, %13, %cst_9 [1] : vector<2x8xf32> to vector<2xf32>
    %15 = vector.shape_cast %14 : vector<2xf32> to vector<2x1xf32>
    %16 = vector.broadcast %15 : vector<2x1xf32> to vector<2x8xf32>
    %17 = arith.subf %13, %16 : vector<2x8xf32>
    %18 = math.exp %17 : vector<2x8xf32>
    %cst_10 = arith.constant dense<0.000000e+00> : vector<2xf32>
    %19 = vector.multi_reduction <add>, %18, %cst_10 [1] : vector<2x8xf32> to vector<2xf32>
    %20 = vector.shape_cast %19 : vector<2xf32> to vector<2x1xf32>
    %21 = vector.broadcast %20 : vector<2x1xf32> to vector<2x8xf32>
    %22 = arith.divf %18, %21 : vector<2x8xf32>
    %23 = vector.shape_cast %22 : vector<2x8xf32> to vector<1x16xf32>
    %c0_11 = arith.constant 0 : index
    %c0_12 = arith.constant 0 : index
    %c0_13 = arith.constant 0 : index
    %24 = vector.load %arg6[%c0_11, %c0_12, %c0_13] : memref<1x1x16xf32, #tpu.memory_space<vmem>>, vector<1x1x16xf32>
    %25 = vector.shape_cast %24 : vector<1x1x16xf32> to vector<1x16xf32>
    %26 = vector.shape_cast %23 : vector<1x16xf32> to vector<1x1x16xf32>
    tpu.vector_store %arg6[%c0_11, %c0_12, %c0_13], %26 {strides = array<i32>} : memref<1x1x16xf32, #tpu.memory_space<vmem>>, vector<1x1x16xf32>,
    return
  }
  func.func @transform_0(%arg0: i32, %arg1: memref<1xi32, #tpu.memory_space<smem>>) -> (i32, i32) {
    %c0_i32 = arith.constant 0 : i32
    %c0_i32_0 = arith.constant 0 : i32
    return %arg0, %c0_i32 : i32, i32
  }
  func.func @transform_1(%arg0: i32, %arg1: memref<1xi32, #tpu.memory_space<smem>>) -> (i32, i32) {
    %c0_i32 = arith.constant 0 : i32
    %c0_i32_0 = arith.constant 0 : i32
    %c0_i32_1 = arith.constant 0 : i32
    return %c0_i32, %c0_i32_0 : i32, i32
  }
  func.func @transform_2(%arg0: i32, %arg1: memref<1xi32, #tpu.memory_space<smem>>) -> (i32, i32) {
    %c0_i32 = arith.constant 0 : i32
    %c0_i32_0 = arith.constant 0 : i32
    %c0_i32_1 = arith.constant 0 : i32
    return %c0_i32, %c0_i32_0 : i32, i32
  }
  func.func @transform_3(%arg0: i32, %arg1: memref<1xi32, #tpu.memory_space<smem>>) -> (i32, i32) {
    %c0_i32 = arith.constant 0 : i32
    %c0_i32_0 = arith.constant 0 : i32
    %c0_i32_1 = arith.constant 0 : i32
    return %c0_i32, %c0_i32_0 : i32, i32
  }
  func.func @transform_4(%arg0: i32, %arg1: memref<1xi32, #tpu.memory_space<smem>>) -> (i32, i32, i32) {
    %c0_i32 = arith.constant 0 : i32
    %c0_i32_0 = arith.constant 0 : i32
    %c0_i32_1 = arith.constant 0 : i32
    return %arg0, %c0_i32, %c0_i32_0 : i32, i32, i32
  }
}

</mosaic_0001>

<bundles_post_ra>
// kernel: tpu_custom_call.1
= control target key start
LH: loop header
LB: loop body
LE: loop exit
PB: predicated region body
PF: predicated region fallthrough
CT: control target
= control target key end

     0   :  { %11 = vsyncpa [#allocation5], 0  ;;  %s1427_s0 = inlined_call_operand.<no memory space> [shape: s32[1], index: 0, kind: input, shape index: {}]   ;;  %s1428_s1 = inlined_call_operand.hbm [shape: bf16[48,384], index: 1, kind: input, shape index: {}]   ;;  %s1429_s2 = inlined_call_operand.hbm [shape: bf16[384,256], index: 2, kind: input, shape index: {}]   ;;  %s1430_s3 = inlined_call_operand.vmem [shape: f32[1,256], index: 3, kind: input, shape index: {}]   ;;  %s1431_s4 = inlined_call_operand.vmem [shape: f32[1,256], index: 4, kind: input, shape index: {}]   ;;  %s1432_s5 = inlined_call_operand.hbm [shape: f32[3,1,16], index: 5, kind: output, shape index: {}]  }
   0x1   :  { %13 = vsyncpa [#allocation5 + $0x1], 0 }
   0x2   :  { %14 = vsyncpa [#allocation8], 0 }
   0x3   :  { %15 = vsyncpa [#allocation6], 0 }
   0x4   :  { %17 = vsyncpa [#allocation6 + $0x1], 0  ;;  %s1226_s0 = smov 0   ;;  %s1228_s18 = smov 0  }
   0x5   :  { %s1230_s19 = smov 0   ;;  %s1232_s20 = smov 0  }
   0x6 LB: > { %s1247_s21 = sadd.s32 4294967295, %s1186_s20   ;;  %s850_s22 = sadd.s32 4294967294, %s1186_s20   ;;  %s1186_s20 = sphi %s1232_s20, %s1453_s20   ;;  %s1182_s19 = sphi %s1230_s19, %s1452_s19   ;;  %s1178_s18 = sphi %s1228_s18, %s1451_s18   ;;  %s1174_s0 = sphi %s1226_s0, %s1450_s0  }
   0x7   : > { %p43_p0 = scmp.ne.s32.totalorder %s1178_s18, %s1174_s0  ;;  %p1433_p1 = scmp.eq.s32.totalorder %s1247_s21, 0 }
   0x8   : > { %p136_p3 = scmp.eq.s32.totalorder %s850_s22, 2  ;;  %p851_p5 = scmp.ge.s32.totalorder %s1186_s20, 1 }
   0x9   : > { %p1256_p4 = por %p1433_p1, %p43_p0  ;;  %p143_p7 = scmp.lt.s32.totalorder %s1186_s20, 4 }
   0xa   : > { %p1261_p6 = por %p136_p3, %p43_p0  ;;  %s1188_s26 = smov [#allocation7]  }
   0xb   : > { %s1437_s23 = scalar_select %p1256_p4, 1, 0 }
   0xc   : > { %s1438_s24 = scalar_select %p1261_p6, 1, 0 }
   0xd   : > { %p1266_p8 = pnand %p851_p5, %p143_p7  ;;  %s155_s27 = sshll.u32 %s1188_s26, 4  ;;  %s156_s27 = int_to_ptr.vmem [resolvable:$true] %s155_s27 }
   0xe   : > { %s1279_s29 = sadd.s32 1, %s1186_s20   ;;  %s30_s30 = sadd.s32 1, %s1182_s19 }
   0xf   : > { %s1439_s25 = scalar_select %p1266_p8, 1, 0 }
  0x10   : > { %p924_p9 = pneg %p1266_p8  ;;  %s27_s6 = ssub.s32 %s1186_s20, %s1279_s29 }
  0x11   : > { %s1075_s7 = scalar_lea.vmem %s156_s27, 6144  ;;  %p1083_p3 = scmp.lt.s32.totalorder %s156_s27, %s156_s27 }
  0x12   : > { %p1274_p10 = pnand %p924_p9, %p1433_p1  ;;  %p1076_p12 = scmp.ne.s32.totalorder %s156_s27, %s1075_s7 }
  0x13   : > { %p1084_p5 = scmp.lt.s32.totalorder %s1075_s7, %s1075_s7 }
  0x14   : > { %p1066_p11 = pneg %p1274_p10 }
  0x15   : > { %p1085_p7 = por %p1084_p5, %p1083_p3 }
  0x16   : > { %p1078_p13 = pnand %p1076_p12, %p1066_p11 }
  0x18   : > { %p1079_p0 = pneg %p1078_p13 }
  0x1a   : > { %p1086_p2 = pnand %p1085_p7, %p1079_p0 }
  0x1c   : > { %1089 = shalt.err (!%p1086_p2)
}
  0x1d   : > { %s1189_s8 = smov 128   ;;  %s1190_s9 = smov 8  }
  0x1e   : > { %927 = dma.hbm_to_vmem [thread:$0]  (!%p1274_p10), %s1429_s2, 6144, %s156_s27, [#allocation8], %s1189_s8, %s1189_s8, %s1190_s9  }
  0x1f   : > { %p28_p9 = scmp.eq.s32.totalorder %s27_s6, 0  ;;  %p37_p11 = scmp.ne.s32.totalorder %s1182_s19, %s1178_s18 }
  0x20   : > { %p38_p12 = scmp.eq.s32.totalorder %s1186_s20, 0  ;;  %p937_p2 = scmp.lt.s32.totalorder %s1186_s20, 3 }
  0x21   : > { %s1296_s12 = scalar_select %p28_p9, %s1182_s19, %s30_s30  }
  0x22   : > { %p39_p13 = por %p38_p12, %p37_p11  ;;  %p1441_p0 = scmp.eq.s32.totalorder %s1247_s21, 2 }
  0x23   : > { %s175_s14 = sand.u32 1, %s1182_s19   ;;  %s914_s15 = smul.u32 384, %s1186_s20 }
  0x24   : > { %p1300_p3 = por %p1441_p0, %p37_p11  ;;  %s913_s16 = smul.u32 24, %s175_s14 }
  0x25   : > { %s1309_s26 = scalar_lea.hbm %s1428_s1, %s914_s15  ;;  %p1311_p10 = pnand %p937_p2, %p39_p13 }
  0x26   : > { %s1442_s13 = scalar_select %p1300_p3, 1, 0 }
  0x27   : > { %s179_s28 = scalar_lea.vmem [#allocation4], %s913_s16  ;;  %s1317_s6 = scalar_lea.sflag [#allocation5], %s175_s14 }
  0x28   : > { %s187_s30 = sshll.u32 %s179_s28, 4  ;;  %s1090_s7 = scalar_lea.hbm %s1309_s26, 384  ;;  %s1315_s30 = int_to_ptr.vmem [resolvable:$true] %s187_s30 }
  0x29   : > { %p1091_p5 = scmp.ne.s32.totalorder %s1309_s26, %s1090_s7  ;;  %p1092_p7 = pneg %p1311_p10 }
  0x2a   : > { %s1095_s10 = scalar_lea.hbm %s1428_s1, 1152  ;;  %p1096_p12 = scmp.lt.s32.totalorder %s1309_s26, %s1428_s1 }
  0x2b   : > { %p1093_p9 = pnand %p1092_p7, %p1091_p5  ;;  %p1097_p2 = scmp.lt.s32.totalorder %s1095_s10, %s1090_s7 }
  0x2d   : > { %p1094_p11 = pneg %p1093_p9  ;;  %p1098_p13 = por %p1097_p2, %p1096_p12 }
  0x2f   : > { %p1099_p0 = pnand %p1098_p13, %p1094_p11 }
  0x31   : > { %1102 = shalt.err (!%p1099_p0)
}
  0x32   : > { %s1103_s14 = scalar_lea.vmem %s1315_s30, 384  ;;  %s1191_s16 = smov [#allocation4]  }
  0x33   : > { %p1104_p1 = scmp.ne.s32.totalorder %s1315_s30, %s1103_s14  ;;  %s1108_s17 = sshll.u32 %s1191_s16, 4  ;;  %s1109_s17 = int_to_ptr.vmem [resolvable:$false] %s1108_s17 }
  0x34   : > { %s1110_s22 = scalar_lea.vmem %s1109_s17, 768  ;;  %p1111_p9 = scmp.lt.s32.totalorder %s1315_s30, %s1109_s17 }
  0x35   : > { %p1106_p6 = pnand %p1104_p1, %p1092_p7  ;;  %p1112_p3 = scmp.lt.s32.totalorder %s1110_s22, %s1103_s14 }
  0x37   : > { %p1107_p5 = pneg %p1106_p6  ;;  %p1113_p4 = por %p1112_p3, %p1111_p9 }
  0x39   : > { %p1114_p8 = pnand %p1113_p4, %p1107_p5 }
  0x3b   : > { %1117 = shalt.err (!%p1114_p8)
}
  0x3c   : > { %s1192_s28 = smov 192   ;;  %s1193_s7 = smov 12  }
  0x3d   : > { %931 = dma.hbm_to_vmem [thread:$0]  (!%p1311_p10), %s1309_s26, 384, %s1315_s30, %s1317_s6, %s1192_s28, %s1192_s28, %s1193_s7  }
  0x3e   : > { %p1444_p1 = scmp.ne.s32.totalorder %s1439_s25, 0 }
  0x3f   : > { %s1341_s8 = sand.u32 (!%p1444_p1), 1, %s1178_s18   ;;  %p1445_p4 = scmp.ne.s32.totalorder (!%p1444_p1), %s1437_s23, 0 }
  0x40   : > { %199 = sbr.rel (%p1444_p1) target bundleno = 1077 (0x435), region = 36  ;;  %s202_s10 = scalar_lea.sflag (!%p1444_p1), [#allocation5], %s1341_s8 }
  0x41   : > { %s915_s9 = smul.u32 (!%p1444_p1), 24, %s1341_s8 }
  0x43   : > { %s1345_s11 = scalar_lea.vmem (!%p1444_p1), [#allocation4], %s915_s9 }
  0x45   : > { %1161 = dma.done.wait (%p1445_p4), %s202_s10, 384  }
  0x46   : > { %1163 = vsyncadd (%p1445_p4), %s202_s10, 4294966912  ;;  %p1446_p6 = scmp.eq.s32.totalorder %s1247_s21, 0 }
  0x48   : > { %1165 = dma.done.wait (%p1446_p6), [#allocation8], 6144   ;;  %p1447_p8 = pmov %p1446_p6 }
  0x49   : > { %v1194_v0 = vmov 0   ;;  %v980_v1 = vld [vmem:[#allocation7 + $0x74] ss:$8 sps:$4 sm:$0xff]   ;;  %v982_v2 = vld [vmem:[#allocation7 + $0x70] ss:$8 sps:$4 sm:$0xff]   ;;  %v289_v52 = vlaneseq  ;;  %vm679_vm0 = vcmask 1041409  }
  0x4a   : > { %1167 = vsyncadd (%p1447_p8), [#allocation8], 4294961152  ;;  %630 = vmatprep.mubr.bf16.mxu1 %v1194_v0  ;;  %979 = vset.pattern.permute.xlu0 %v1194_v0  ;;  %v983_v3 = vld [vmem:[#allocation7 + $0x64] ss:$8 sps:$4 sm:$0xff]   ;;  %v985_v4 = vld [vmem:[#allocation7 + $0x60] ss:$8 sps:$4 sm:$0xff]  }
  0x4b   : > { %978 = vset.pattern.permute.xlu1 %v1194_v0  ;;  %555 = vmatprep.subr.bf16.mxu0 %v980_v1  ;;  %v986_v5 = vld [vmem:[#allocation7 + $0x54] ss:$8 sps:$4 sm:$0xff]   ;;  %v988_v6 = vld [vmem:[#allocation7 + $0x50] ss:$8 sps:$4 sm:$0xff]   ;;  %v989_v7 = vld [vmem:[#allocation7 + $0x44] ss:$8 sps:$4 sm:$0xff]  }
  0x4c   : > { %556 = vmatpush1.bf16.msra.mxu0 %v982_v2  ;;  %v991_v8 = vld [vmem:[#allocation7 + $0x40] ss:$8 sps:$4 sm:$0xff]   ;;  %v1003_v9 = vld [vmem:[#allocation7 + $0x174] ss:$8 sps:$4 sm:$0xff]   ;;  %v1006_v10 = vld [vmem:[#allocation7 + $0x170] ss:$8 sps:$4 sm:$0xff]  }
  0x4d   : > { %557 = vmatprep.subr.bf16.mxu0 %v983_v3  ;;  %v992_v11 = vld [vmem:[#allocation7 + $0x34] ss:$8 sps:$4 sm:$0xff]   ;;  %598 = vmatprep.subr.bf16.mxu1 %v1003_v9  ;;  %v1009_v12 = vld [vmem:[#allocation7 + $0x164] ss:$8 sps:$4 sm:$0xff]   ;;  %v1012_v13 = vld [vmem:[#allocation7 + $0x160] ss:$8 sps:$4 sm:$0xff]  }
  0x4e   : > { %599 = vmatpush1.bf16.msra.mxu1 %v1006_v10  ;;  %v994_v14 = vld [vmem:[#allocation7 + $0x30] ss:$8 sps:$4 sm:$0xff]   ;;  %v995_v15 = vld [vmem:[#allocation7 + $0x24] ss:$8 sps:$4 sm:$0xff]   ;;  %v1015_v16 = vld [vmem:[#allocation7 + $0x154] ss:$8 sps:$4 sm:$0xff]  }
  0x4f   : > { %600 = vmatprep.subr.bf16.mxu1 %v1009_v12  ;;  %v1018_v17 = vld [vmem:[#allocation7 + $0x150] ss:$8 sps:$4 sm:$0xff]   ;;  %v997_v18 = vld [vmem:[#allocation7 + $0x20] ss:$8 sps:$4 sm:$0xff]   ;;  %v1021_v19 = vld [vmem:[#allocation7 + $0x144] ss:$8 sps:$4 sm:$0xff]  }
  0x50   : > { %558 = vmatpush1.bf16.msra.mxu0 %v985_v4  ;;  %v998_v20 = vld [vmem:[#allocation7 + $0x14] ss:$8 sps:$4 sm:$0xff]   ;;  %v1000_v21 = vld [vmem:[#allocation7 + $0x10] ss:$8 sps:$4 sm:$0xff]   ;;  %v1024_v22 = vld [vmem:[#allocation7 + $0x140] ss:$8 sps:$4 sm:$0xff]  }
  0x51   : > { %559 = vmatprep.subr.bf16.mxu0 %v986_v5  ;;  %v1027_v23 = vld [vmem:[#allocation7 + $0x134] ss:$8 sps:$4 sm:$0xff]   ;;  %v1001_v24 = vld [vmem:[#allocation7 + $0x4] ss:$8 sps:$4 sm:$0xff]   ;;  %v1030_v25 = vld [vmem:[#allocation7 + $0x130] ss:$8 sps:$4 sm:$0xff]  }
  0x52   : > { %601 = vmatpush1.bf16.msra.mxu1 %v1012_v13  ;;  %v1005_v26 = vld [vmem:[#allocation7] ss:$8 sps:$4 sm:$0xff]   ;;  %v1033_v27 = vld [vmem:[#allocation7 + $0x124] ss:$8 sps:$4 sm:$0xff]   ;;  %v1007_v28 = vld [vmem:[#allocation7 + $0xf4] ss:$8 sps:$4 sm:$0xff]  }
  0x53   : > { %602 = vmatprep.subr.bf16.mxu1 %v1015_v16  ;;  %v1011_v29 = vld [vmem:[#allocation7 + $0xf0] ss:$8 sps:$4 sm:$0xff]   ;;  %v1036_v30 = vld [vmem:[#allocation7 + $0x120] ss:$8 sps:$4 sm:$0xff]   ;;  %v1039_v31 = vld [vmem:[#allocation7 + $0x114] ss:$8 sps:$4 sm:$0xff]  }
  0x54   : > { %560 = vmatpush1.bf16.msra.mxu0 %v988_v6  ;;  %v1013_v32 = vld [vmem:[#allocation7 + $0xe4] ss:$8 sps:$4 sm:$0xff]   ;;  %v1042_v33 = vld [vmem:[#allocation7 + $0x110] ss:$8 sps:$4 sm:$0xff]   ;;  %v1017_v35 = vld [vmem:[#allocation7 + $0xe0] ss:$8 sps:$4 sm:$0xff]  }
  0x55   : > { %561 = vmatprep.subr.bf16.mxu0 %v989_v7  ;;  %v1055_v34 = vld [vmem:[%s1345_s11 + $0x4] ss:$12 sps:$4 sm:$0xff]   ;;  %v1051_v41 = vld [vmem:[%s1345_s11 + $0x8] ss:$12 sps:$4 sm:$0xff]   ;;  %v1053_v51 = vld [vmem:[%s1345_s11] ss:$12 sps:$4 sm:$0xff]  }
  0x56   : > { %603 = vmatpush1.bf16.msra.mxu1 %v1018_v17  ;;  %v1045_v36 = vld [vmem:[#allocation7 + $0x104] ss:$8 sps:$4 sm:$0xff]   ;;  %v1019_v37 = vld [vmem:[#allocation7 + $0xd4] ss:$8 sps:$4 sm:$0xff]   ;;  %587 = vmatprep.mubr.bf16.mxu0 %v1055_v34  ;;  %v1048_v38 = vld [vmem:[#allocation7 + $0x100] ss:$8 sps:$4 sm:$0xff]  }
  0x57   : > { %604 = vmatprep.subr.bf16.mxu1 %v1021_v19  ;;  %v1023_v39 = vld [vmem:[#allocation7 + $0xd0] ss:$8 sps:$4 sm:$0xff]   ;;  %v1025_v40 = vld [vmem:[#allocation7 + $0xc4] ss:$8 sps:$4 sm:$0xff]   ;;  %v1029_v42 = vld [vmem:[#allocation7 + $0xc0] ss:$8 sps:$4 sm:$0xff]  }
  0x58   : > { %562 = vmatpush1.bf16.msra.mxu0 %v991_v8  ;;  %v1031_v43 = vld [vmem:[#allocation7 + $0xb4] ss:$8 sps:$4 sm:$0xff]   ;;  %v1035_v44 = vld [vmem:[#allocation7 + $0xb0] ss:$8 sps:$4 sm:$0xff]   ;;  %v1037_v45 = vld [vmem:[#allocation7 + $0xa4] ss:$8 sps:$4 sm:$0xff]  }
  0x59   : > { %563 = vmatprep.subr.bf16.mxu0 %v992_v11  ;;  %v1041_v46 = vld [vmem:[#allocation7 + $0xa0] ss:$8 sps:$4 sm:$0xff]   ;;  %v1043_v47 = vld [vmem:[#allocation7 + $0x94] ss:$8 sps:$4 sm:$0xff]   ;;  %v1047_v48 = vld [vmem:[#allocation7 + $0x90] ss:$8 sps:$4 sm:$0xff]  }
  0x5a   : > { %605 = vmatpush1.bf16.msra.mxu1 %v1024_v22  ;;  %v1049_v49 = vld [vmem:[#allocation7 + $0x84] ss:$8 sps:$4 sm:$0xff]   ;;  %v1052_v50 = vld [vmem:[#allocation7 + $0x80] ss:$8 sps:$4 sm:$0xff]   ;;  %v1358_v53 = vshrl.u32 %v289_v52, 7  ;;  %vm682_vm1 = vcmask 58368  }
  0x5b   : > { %606 = vmatprep.subr.bf16.mxu1 %v1027_v23  ;;  %v287_v55 = vld [vmem:[%s1430_s3] sm:$0x3]  ;;  %s910_s30 = sshll.u32 %s1247_s21, 4  ;;  %s232_s6 = scalar_lea.vmem [#allocation9], %s1341_s8  ;;  %vm756_vm2 = vcmask 130112   ;;  %vm759_vm3 = vcmask 122880  }
  0x5c   : > { %564 = vmatpush1.bf16.msra.mxu0 %v994_v14  ;;  %v1361_v54 = vsub.s32 0, %v1358_v53  ;;  %v1367_v56 = vsub.s32 1, %v1358_v53  ;;  %v645_v63 = vld [vmem:[%s1431_s4] sm:$0x3]  ;;  %s774_s15 = sshll.u32 %s232_s6, 4  ;;  %s1391_s17 = scalar_lea.hbm %s1432_s5, %s910_s30  ;;  %s775_s15 = int_to_ptr.vmem [resolvable:$true] %s774_s15 }
  0x5d   : > { %565 = vmatprep.subr.bf16.mxu0 %v995_v15  ;;  %s762_s22 = scalar_lea.sflag [#allocation6], %s1341_s8  ;;  %s1118_s28 = scalar_lea.vmem %s775_s15, 16 }
  0x5e   : > { %607 = vmatpush1.bf16.msra.mxu1 %v1030_v25  ;;  %v292_v58 = vrot.slane %v287_v55, %v1361_v54  ;;  %v296_v59 = vrot.slane %v287_v55, %v1367_v56  ;;  %v650_v5 = vrot.slane %v645_v63, %v1361_v54  ;;  %v654_v9 = vrot.slane %v645_v63, %v1367_v56  ;;  %p1119_p3 = scmp.ne.s32.totalorder %s775_s15, %s1118_s28  ;;  %p1448_p10 = scmp.ne.s32.totalorder %s1442_s13, 0 }
  0x5f   : > { %608 = vmatprep.subr.bf16.mxu1 %v1033_v27  ;;  %s1195_s21 = smov [#allocation9]  }
  0x60   : > { %566 = vmatpush1.bf16.msra.mxu0 %v997_v18  ;;  %p1120_p7 = pnand %p1119_p3, %p1448_p10  ;;  %s1122_s7 = sshll.u32 %s1195_s21, 4  ;;  %s1123_s7 = int_to_ptr.vmem [resolvable:$false] %s1122_s7 }
  0x61   : > { %567 = vmatprep.subr.bf16.mxu0 %v998_v20  ;;  %s1124_s9 = scalar_lea.vmem %s1123_s7, 32  ;;  %p1125_p12 = scmp.lt.s32.totalorder %s775_s15, %s1123_s7 }
  0x62   : > { %609 = vmatpush1.bf16.msra.mxu1 %v1036_v30  ;;  %p1121_p11 = pneg %p1120_p7  ;;  %p1126_p2 = scmp.lt.s32.totalorder %s1124_s9, %s1118_s28 }
  0x63   : > { %610 = vmatprep.subr.bf16.mxu1 %v1039_v31 }
  0x64   : > { %568 = vmatpush1.bf16.msra.mxu0 %v1000_v21  ;;  %p1127_p13 = por %p1126_p2, %p1125_p12 }
  0x65   : > { %569 = vmatprep.subr.bf16.mxu0 %v1001_v24  ;;  %v670_v24 = vand.u32 127, %v289_v52 }
  0x66   : > { %611 = vmatpush1.bf16.msra.mxu1 %v1042_v33  ;;  %p1128_p0 = pnand %p1127_p13, %p1121_p11 }
  0x67   : > { %612 = vmatprep.subr.bf16.mxu1 %v1045_v36 }
  0x68   : > { %570 = vmatpush1.bf16.msra.mxu0 %v1005_v26  ;;  %v673_v26 = vsub.s32 %v670_v24, %v1358_v53 }
  0x69   : > { %571 = vmatprep.subr.bf16.mxu0 %v1007_v28 }
  0x6a   : > { %613 = vmatpush1.bf16.msra.mxu1 %v1048_v38 }
  0x6c   : > { %572 = vmatpush2.bf16.msra.mxu0 %v1011_v29 }
  0x6d   : > { %573 = vmatprep.subr.bf16.mxu0 %v1013_v32  ;;  %631 = vmatmul.mubr.bf16.vlgmr.msra.gmra.mxu1 %v1051_v41 }
  0x70   : > { %574 = vmatpush2.bf16.msra.mxu0 %v1017_v35 }
  0x71   : > { %575 = vmatprep.subr.bf16.mxu0 %v1019_v37 }
  0x74   : > { %576 = vmatpush2.bf16.msra.mxu0 %v1023_v39 }
  0x75   : > { %577 = vmatprep.subr.bf16.mxu0 %v1025_v40 }
  0x78   : > { %578 = vmatpush2.bf16.msra.mxu0 %v1029_v42 }
  0x79   : > { %579 = vmatprep.subr.bf16.mxu0 %v1031_v43 }
  0x7c   : > { %580 = vmatpush2.bf16.msra.mxu0 %v1035_v44 }
  0x7d   : > { %581 = vmatprep.subr.bf16.mxu0 %v1037_v45 }
  0x80   : > { %582 = vmatpush2.bf16.msra.mxu0 %v1041_v46 }
  0x81   : > { %583 = vmatprep.subr.bf16.mxu0 %v1043_v47 }
  0x84   : > { %584 = vmatpush2.bf16.msra.mxu0 %v1047_v48 }
  0x85   : > { %585 = vmatprep.subr.bf16.mxu0 %v1049_v49 }
  0x88   : > { %586 = vmatpush2.bf16.msra.mxu0 %v1052_v50 }
  0x8b   : > { %588 = vmatmul.mubr.bf16.vlgmr.msra.gmra.mxu0 %v1053_v51 }
 0x12d   : > { %v632_v57 = vpop.f32.mrf.mxu1 }
 0x12f   : > { %v634_v60 = vpop.f32.mrf.mxu1 }
 0x131   : > { %v636_v3 = vpop.f32.mrf.mxu1 }
 0x133   : > { %v638_v14 = vpop.f32.mrf.mxu1 }
 0x14b   : > { %v589_v61 = vpop.f32.mrf.mxu0 }
 0x14c   : > { %v590_v62 = vadd.f32 %v589_v61, %v292_v58 }
 0x14d   : > { %v591_v0 = vpop.f32.mrf.mxu0 }
 0x14e   : > { %v633_v1 = vadd.f32 %v632_v57, %v590_v62  ;;  %v592_v2 = vadd.f32 %v591_v0, %v296_v59  ;;  %v751_v57 = vadd.s32 4294967288, %v670_v24 }
 0x14f   : > { %v593_v4 = vpop.f32.mrf.mxu0 }
 0x150   : > { %v641_v6 = vmax.f32 %v633_v1, 0.0  ;;  %v635_v7 = vadd.f32 %v634_v60, %v592_v2  ;;  %v594_v8 = vadd.f32 %v593_v4, %v292_v58 }
 0x151   : > { %v595_v10 = vpop.f32.mrf.mxu0 }
 0x152   : > { %v642_v11 = vmax.f32 %v635_v7, 0.0  ;;  %v637_v12 = vadd.f32 %v636_v3, %v594_v8  ;;  %v596_v13 = vadd.f32 %v595_v10, %v296_v59  ;;  %v657_v17 = vmul.f32 %v650_v5, %v641_v6 }
 0x153   : > { %v754_v59 = vsub.s32 %v751_v57, %v1358_v53 }
 0x154   : > { %v643_v15 = vmax.f32 %v637_v12, 0.0  ;;  %v639_v16 = vadd.f32 %v638_v14, %v596_v13  ;;  %v658_v18 = vmul.f32 %v654_v9, %v642_v11 }
 0x156   : > { %v644_v19 = vmax.f32 %v639_v16, 0.0  ;;  %v661_v20 = vadd.f32 %v658_v18, %v657_v17  ;;  %v659_v21 = vmul.f32 %v650_v5, %v643_v15 }
 0x158   : > { %662 = vadd.xlane.f32.xlu0 %v661_v20  ;;  %v660_v22 = vmul.f32 %v654_v9, %v644_v19 }
 0x15a   : > { %v664_v23 = vadd.f32 %v660_v22, %v659_v21 }
 0x15c   : > { %665 = vadd.xlane.f32.xlu0 %v664_v23 }
 0x1e1   : > { %v663_v25 = vpop.xlane.xlu0 %662 }
 0x1e2   : > { %v674_v28 = vrot.slane %v663_v25, %v673_v26 }
 0x1e5   : > { %v666_v27 = vpop.xlane.xlu0 %665 }
 0x1e6   : > { %v678_v29 = vrot.slane %v666_v27, %v673_v26 }
 0x1e8   : > { %v680_v30 = vsel %vm679_vm0, %v678_v29, %v674_v28 }
 0x1e9   : > { %v683_v31 = vsel %vm682_vm1, %v680_v30, -inf }
 0x1ea   : > { %684 = vmax.xlane.f32.xlu1 %v683_v31 }
 0x273   : > { %v685_v32 = vpop.xlane.xlu1 %684 }
 0x274   : > { %v690_v33 = vrot.slane %v685_v32, %v1361_v54  ;;  %v694_v34 = vrot.slane %v685_v32, %v1367_v56 }
 0x276   : > { %v697_v35 = vsub.f32 %v663_v25, %v690_v33  ;;  %v698_v36 = vsub.f32 %v666_v27, %v694_v34 }
 0x278   : > { %v699_v37 = vmul.f32 1.442695, %v697_v35  ;;  %v701_v38 = vmul.f32 1.442695, %v698_v36 }
 0x27a   : > { %1056 = vpow2.f32 %v699_v37 }
 0x27b   : > { %1058 = vpow2.f32 %v701_v38 }
 0x287   : > { %v1057_v39 = vpop.eup %1056 }
 0x288   : > { %v1059_v40 = vpop.eup %1058  ;;  %706 = vperm.xlu1 %978, %v1057_v39  }
 0x289   : > { %709 = vperm.xlu0 %979, %v1059_v40  }
 0x303   : > { %v707_v41 = vpop.permute.xlu1 %706 }
 0x304   : > { %v710_v42 = vpop.permute.xlu0 %709  ;;  %v714_v43 = vrot.slane %v707_v41, %v673_v26 }
 0x305   : > { %v718_v44 = vrot.slane %v710_v42, %v673_v26 }
 0x307   : > { %v719_v45 = vsel %vm679_vm0, %v718_v44, %v714_v43 }
 0x308   : > { %v721_v46 = vsel %vm682_vm1, %v719_v45, 0.0 }
 0x309   : > { %722 = vadd.xlane.f32.xlu1 %v721_v46 }
 0x392   : > { %v723_v47 = vpop.xlane.xlu1 %722 }
 0x393   : > { %v728_v48 = vrot.slane %v723_v47, %v1361_v54  ;;  %v732_v49 = vrot.slane %v723_v47, %v1367_v56 }
 0x395   : > { %1060 = vrcp.f32 %v728_v48 }
 0x396   : > { %1062 = vrcp.f32 %v732_v49 }
 0x3a2   : > { %v1061_v50 = vpop.eup %1060 }
 0x3a3   : > { %v736_v51 = vmul.f32 %v1061_v50, %v1057_v39  ;;  %v1063_v52 = vpop.eup %1062 }
 0x3a4   : > { %v738_v55 = vmul.f32 %v1063_v52, %v1059_v40 }
 0x3a5   : > { %742 = vperm.xlu0 %979, %v736_v51  }
 0x3a9   : > { %745 = vperm.xlu0 %979, %v738_v55  }
 0x420   : > { %v743_v58 = vpop.permute.xlu0 %742 }
 0x421   : > { %v750_v56 = vrot.slane %v743_v58, %v673_v26 }
 0x424   : > { %v746_v54 = vpop.permute.xlu0 %745 }
 0x425   : > { %v755_v60 = vrot.slane %v746_v54, %v754_v59 }
 0x427   : > { %v757_v61 = vsel %vm756_vm2, %v755_v60, %v750_v56 }
 0x428   : > { %760 = vst.msk [vmem:[%s232_s6] sm:$0x1] %vm759_vm3, %v757_v61 }
 0x429   : > { %1131 = shalt.err (!%p1128_p0)
}
 0x42a   : > { %s1132_s10 = scalar_lea.hbm %s1391_s17, 16  ;;  %s1136_s23 = scalar_lea.hbm %s1432_s5, 48 }
 0x42b   : > { %p1133_p5 = scmp.ne.s32.totalorder %s1391_s17, %s1132_s10  ;;  %p1137_p4 = scmp.lt.s32.totalorder %s1391_s17, %s1432_s5 }
 0x42c   : > { %p1138_p6 = scmp.lt.s32.totalorder %s1136_s23, %s1132_s10 }
 0x42d   : > { %p1134_p9 = pnand %p1133_p5, %p1448_p10 }
 0x42e   : > { %p1139_p8 = por %p1138_p6, %p1137_p4 }
 0x42f   : > { %p1135_p1 = pneg %p1134_p9 }
 0x431   : > { %p1140_p3 = pnand %p1139_p8, %p1135_p1 }
 0x433   : > { %1143 = shalt.err (!%p1140_p3)
}
 0x434   : > { %922 = dma.vmem_to_hbm [thread:$0]  (%p1448_p10), %s775_s15, 16, %s1391_s17, %s762_s22  }
 0x435 PF: > { %p939_p7 = scmp.ge.s32.totalorder %s1186_s20, 2  ;;  %s786_s27 = sand.u32 1, %s1174_s0  }
 0x436   : > { %p1449_p11 = scmp.ne.s32.totalorder %s1438_s24, 0  ;;  %s787_s30 = scalar_lea.sflag [#allocation6], %s786_s27 }
 0x438   : > { %p933_p12 = pnand %p939_p7, %p1449_p11 }
 0x43a   : > { %p934_p2 = pneg %p933_p12 }
 0x43c   : > { %1169 = dma.done.wait (%p934_p2), %s787_s30, 16  }
 0x43d   : > { %1171 = vsyncadd (%p934_p2), %s787_s30, 4294967280  ;;  %p20_p13 = scmp.ge.s32.totalorder %s1279_s29, 5   ;;  %s1450_s0 = smov %s1178_s18 }
 0x43e   : > { %s1451_s18 = smov %s1182_s19  ;;  %s1452_s19 = smov %s1296_s12 }
 0x43f   : > { %s1453_s20 = smov %s1279_s29  ;;  %22 = sbr.rel (!%p20_p13) target bundleno = 6 (0x6), region = 85 }
 0x444   :  { %791 = vsyncpa [#allocation5], 1 }
 0x445   :  { %793 = vsyncpa [#allocation5 + $0x1], 1 }
 0x446   :  { %794 = vsyncpa [#allocation8], 1 }
 0x447   :  { %795 = vsyncpa [#allocation6], 1 }
 0x448   :  { %797 = vsyncpa [#allocation6 + $0x1], 1 }

</bundles_post_ra>
